<compile_context>
chip_gen: v7x
topology: tpu7x:2x2x1
jax: 0.10.0
libtpu: 0.0.40
codegen_flags: <defaults>
</compile_context>

<pallas_src>
import functools

import jax
import jax.numpy as jnp
from jax.experimental import pallas as pl
from jax.experimental.pallas import tpu as pltpu

_MiB = 1024 * 1024


# --------------------------------------------------------------------------
# Kernels
# --------------------------------------------------------------------------
def _full_m_kernel(path_ref, x_ref, o_ref, *, mean: bool):
    # path_ref: (1, tn, M), x_ref: (1, M, D), o_ref: (1, tn, D)
    p = path_ref[0]                                            # (tn, M)
    x = x_ref[0]                                               # (M, D)

    acc = jnp.dot(p, x, preferred_element_type=jnp.float32)   # MXU, f32 acc

    if mean:
        # f32 row degree without materializing an f32 copy of the path tile.
        rowsum = jnp.sum(p, axis=-1, keepdims=True, dtype=jnp.float32)
        # torch: norm_out[isinf(norm_out)] = 0  <=>  zero-degree rows -> 0.
        norm = jnp.where(rowsum == 0.0, 0.0, 1.0 / rowsum)
        acc = acc * norm

    o_ref[0] = acc.astype(o_ref.dtype)


def _k_tiled_kernel(path_ref, x_ref, o_ref, acc_ref, rsum_ref, *, mean: bool):
    # path_ref: (1, tn, tk), x_ref: (1, tk, D), o_ref: (1, tn, D)
    # acc_ref : (tn, D) f32 scratch, rsum_ref: (tn, 1) f32 scratch
    k = pl.program_id(2)

    @pl.when(k == 0)
    def _():
        acc_ref[...] = jnp.zeros_like(acc_ref)
        rsum_ref[...] = jnp.zeros_like(rsum_ref)

    p = path_ref[0]                                            # (tn, tk)
    acc_ref[...] += jnp.dot(p, x_ref[0], preferred_element_type=jnp.float32)
    if mean:
        rsum_ref[...] += jnp.sum(p, axis=-1, keepdims=True, dtype=jnp.float32)

    @pl.when(k == pl.num_programs(2) - 1)
    def _():
        acc = acc_ref[...]
        if mean:
            rs = rsum_ref[...]
            acc = acc * jnp.where(rs == 0.0, 0.0, 1.0 / rs)
        o_ref[0] = acc.astype(o_ref.dtype)


# --------------------------------------------------------------------------
# Tile selection (VMEM-budget aware)
# --------------------------------------------------------------------------
def _vmem_capacity_bytes() -> int:
    try:
        return int(pltpu.get_tpu_info().vmem_capacity_bytes)
    except Exception:
        return 64 * _MiB  # conservative default (v7x per-TensorCore VMEM)


def _round_up(x: int, m: int) -> int:
    return -(-x // m) * m


def _choose_tn_full_m(N, M, D, bp, bx, bo, budget, B):
    """Largest N-tile whose double-buffered working set fits `budget`.

    Working set ~ 2*tn*M (path) + 2*M*D (X slab) + 2*tn*D (out).
    Returns None if even tn=8 does not fit (caller falls back to K-tiling).
    """
    x_bytes = 2 * M * D * bx

    def ws(tn):
        return 2 * tn * M * bp + x_bytes + 2 * tn * D * bo

    if ws(min(8, N)) > budget:
        return None

    if N <= 1024 and ws(N) <= budget:
        tn = N                                   # one tile per batch
    else:
        tn = 8
        for c in (1024, 512, 256, 128, 64, 32, 16, 8):
            if c <= N and ws(c) <= budget:
                tn = c
                break

    # v7x megacore: guarantee >= 2 grid steps when B == 1 (both TCs busy).
    if B == 1 and N > 8 and pl.cdiv(N, tn) == 1:
        tn = max(8, _round_up(pl.cdiv(N, 2), 8))
    return tn


def _choose_k_tiles(N, M, D, bp, bx, bo, budget):
    """Pick (tn, tk) for the K-tiled variant.

    tk must divide M (a partial K block would accumulate stale VMEM garbage)
    and be a multiple of 128 (path's lane dim).  Returns None if impossible.
    """
    tk_cands = [c for c in (2048, 1024, 512, 256, 128) if c < M and M % c == 0]
    if not tk_cands:
        return None

    tn_cands = [c for c in (512, 256, 128, 64, 32, 16, 8) if c <= N] or [N]

    def ws(tn, tk):
        return (2 * tn * tk * bp + 2 * tk * D * bx + 2 * tn * D * bo
                + tn * D * 4 + tn * 4)           # + f32 acc / rowsum scratch

    for tk in tk_cands:
        for tn in tn_cands:
            if ws(tn, tk) <= budget:
                return tn, tk
    return tn_cands[-1], tk_cands[-1]            # best effort


# --------------------------------------------------------------------------
# pallas_call wrappers
# --------------------------------------------------------------------------
def _full_m_call(path, X, out_dtype, tn, mean, vmem_limit, cost):
    B, N, M = path.shape
    D = X.shape[-1]
    kernel = functools.partial(_full_m_kernel, mean=mean)
    return pl.pallas_call(
        kernel,
        out_shape=jax.ShapeDtypeStruct((B, N, D), out_dtype),
        grid_spec=pl.GridSpec(
            grid=(B, pl.cdiv(N, tn)),
            in_specs=[
                # path tile: (1, tn, M)
                pl.BlockSpec((1, tn, M), lambda b, i: (b, i, 0)),
                # full X slab for this batch; constant index across the inner
                # N-tile axis -> DMA'd from HBM only once per batch.
                pl.BlockSpec((1, M, D), lambda b, i: (b, 0, 0)),
            ],
            out_specs=pl.BlockSpec((1, tn, D), lambda b, i: (b, i, 0)),
        ),
        compiler_params=pltpu.CompilerParams(
            dimension_semantics=("parallel", "parallel"),
            vmem_limit_bytes=vmem_limit,
        ),
        cost_estimate=cost,
    )(path, X)


def _k_tiled_call(path, X, out_dtype, tn, tk, mean, vmem_limit, cost):
    B, N, M = path.shape
    D = X.shape[-1]
    kernel = functools.partial(_k_tiled_kernel, mean=mean)
    return pl.pallas_call(
        kernel,
        out_shape=jax.ShapeDtypeStruct((B, N, D), out_dtype),
        grid_spec=pltpu.PrefetchScalarGridSpec(
            num_scalar_prefetch=0,
            grid=(B, pl.cdiv(N, tn), M // tk),
            in_specs=[
                pl.BlockSpec((1, tn, tk), lambda b, i, k: (b, i, k)),
                pl.BlockSpec((1, tk, D), lambda b, i, k: (b, k, 0)),
            ],
            out_specs=pl.BlockSpec((1, tn, D), lambda b, i, k: (b, i, 0)),
            scratch_shapes=[
                pltpu.VMEM((tn, D), jnp.float32),   # f32 accumulator
                pltpu.VMEM((tn, 1), jnp.float32),   # f32 rowsum (degree)
            ],
        ),
        compiler_params=pltpu.CompilerParams(
            dimension_semantics=("parallel", "parallel", "arbitrary"),
            vmem_limit_bytes=vmem_limit,
        ),
        cost_estimate=cost,
    )(path, X)


# --------------------------------------------------------------------------
# Public entry point
# --------------------------------------------------------------------------
def message_agg(path: jax.Array, X: jax.Array, agg_method: str = "mean",
                force_variant: str | None = None) -> jax.Array:
    """Pallas TPU implementation of MessageAgg.forward.

    path: [B, N, M], X: [B, M, D]  ->  out: [B, N, D]
    force_variant: None | "full_m" | "k_tiled"  (testing/debug override)
    """
    assert path.ndim == 3 and X.ndim == 3, "expected batched 3D path / X"
    B, N, M = path.shape
    Bx, Mx, D = X.shape
    assert Bx == B and Mx == M, f"shape mismatch: path {path.shape}, X {X.shape}"

    out_dtype = jnp.promote_types(path.dtype, X.dtype)
    bp = jnp.dtype(path.dtype).itemsize
    bx = jnp.dtype(X.dtype).itemsize
    bo = jnp.dtype(out_dtype).itemsize
    mean = (agg_method == "mean")

    # VMEM budgeting: the scoped default (16/32 MiB) is far below physical
    # VMEM (128 MiB v5e/v6e, 64 MiB v7x).  Raise the limit explicitly and
    # size tiles against ~80% of it.
    vmem_cap = _vmem_capacity_bytes()
    vmem_limit = min(int(vmem_cap * 0.85), 100 * _MiB)
    budget = int(vmem_limit * 0.80)

    cost = pl.CostEstimate(
        flops=2 * B * N * M * D,
        transcendentals=0,
        bytes_accessed=B * N * M * bp + B * M * D * bx + B * N * D * bo,
    )

    if force_variant != "k_tiled":
        tn = _choose_tn_full_m(N, M, D, bp, bx, bo, budget, B)
        if tn is not None or force_variant == "full_m":
            if tn is None:
                tn = min(8, N)
            return _full_m_call(path, X, out_dtype, tn, mean, vmem_limit, cost)

    # K-tiled fallback: the (M, D) X slab does not fit VMEM even at tn=8
    # (or the caller forced this variant).
    kt = _choose_k_tiles(N, M, D, bp, bx, bo, budget)
    if kt is None:
        # TODO(synk): M has no 128-multiple divisor; best-effort full-M path
        # with the VMEM limit pushed towards physical capacity.
        return _full_m_call(path, X, out_dtype, min(8, N), mean,
                            int(vmem_cap * 0.95), cost)
    tn, tk = kt
    return _k_tiled_call(path, X, out_dtype, tn, tk, mean, vmem_limit, cost)


# --------------------------------------------------------------------------
# Pure-JAX reference + self-test
# --------------------------------------------------------------------------
def message_agg_ref(path: jax.Array, X: jax.Array, agg_method: str = "mean") -> jax.Array:
    out = jnp.matmul(path, X)
    if agg_method == "mean":
        rowsum = jnp.sum(path, axis=2, keepdims=True)
        inv = 1.0 / rowsum
        inv = jnp.where(jnp.isinf(inv), 0.0, inv)
        out = inv * out
    return out


if __name__ == "__main__":
    key = jax.random.PRNGKey(0)
    k1, k2, k3, k4 = jax.random.split(key, 4)

    # --- small shapes implied by the module (full-M / X-resident variant) ---
    B, N, M, D = 2, 8, 8, 32
    path = (jax.random.uniform(k1, (B, N, M)) > 0.5).astype(jnp.float32)
    path = path.at[0, 0, :].set(0.0)          # zero-degree row -> inf->0 path
    X = jax.random.normal(k2, (B, M, D), dtype=jnp.float32)

    out_mean = jax.block_until_ready(message_agg(path, X, agg_method="mean"))
    ref_mean = message_agg_ref(path, X, agg_method="mean")
    assert out_mean.shape == (B, N, D) and out_mean.dtype == X.dtype
    assert jnp.allclose(out_mean, ref_mean, atol=1e-5, rtol=1e-5)

    out_sum = jax.block_until_ready(message_agg(path, X, agg_method="sum"))
    ref_sum = message_agg_ref(path, X, agg_method="sum")
    assert jnp.allclose(out_sum, ref_sum, atol=1e-5, rtol=1e-5)

    # --- exercise the K-tiled fallback (reduction axis in the grid) ---
    B2, N2, M2, D2 = 2, 16, 256, 32
    path2 = (jax.random.uniform(k3, (B2, N2, M2)) > 0.5).astype(jnp.float32)
    path2 = path2.at[1, 3, :].set(0.0)
    X2 = jax.random.normal(k4, (B2, M2, D2), dtype=jnp.float32)

    out_k = jax.block_until_ready(
        message_agg(path2, X2, agg_method="mean", force_variant="k_tiled"))
    ref_k = message_agg_ref(path2, X2, agg_method="mean")
    assert jnp.allclose(out_k, ref_k, atol=1e-4, rtol=1e-4)

    print("KERNEL_OK")
</pallas_src>

<mosaic_0001>
module attributes {stable_mosaic.version = 11 : i64} {
  func.func @_full_m_kernel(%arg0: i32, %arg1: i32, %arg2: memref<1x8x8xf32, #tpu.memory_space<vmem>>, %arg3: memref<1x8x32xf32, #tpu.memory_space<vmem>>, %arg4: memref<1x8x32xf32, #tpu.memory_space<vmem>>) attributes {dimension_semantics = [#tpu.dimension_semantics<parallel>, #tpu.dimension_semantics<parallel>], iteration_bounds = array<i64: 2, 1>, scalar_prefetch = 0 : i64, scratch_operands = 0 : i64, tpu.core_type = #tpu.core_type<tc>, window_params = [{transform_indices = @transform_0, window_bounds = array<i64: 1, 8, 8>}, {transform_indices = @transform_1, window_bounds = array<i64: 1, 8, 32>}, {transform_indices = @transform_2, window_bounds = array<i64: 1, 8, 32>}]} {
    %c0 = arith.constant 0 : index
    %c0_0 = arith.constant 0 : index
    %c0_1 = arith.constant 0 : index
    %0 = vector.load %arg2[%c0, %c0_0, %c0_1] : memref<1x8x8xf32, #tpu.memory_space<vmem>>, vector<1x8x8xf32>
    %1 = vector.shape_cast %0 : vector<1x8x8xf32> to vector<8x8xf32>
    %c0_2 = arith.constant 0 : index
    %c0_3 = arith.constant 0 : index
    %c0_4 = arith.constant 0 : index
    %2 = vector.load %arg3[%c0_2, %c0_3, %c0_4] : memref<1x8x32xf32, #tpu.memory_space<vmem>>, vector<1x8x32xf32>
    %3 = vector.shape_cast %2 : vector<1x8x32xf32> to vector<8x32xf32>
    %cst = arith.constant dense<0.000000e+00> : vector<8x32xf32>
    %4 = tpu.matmul %1, %3, %cst {dimension_numbers = #tpu.dot_dimension_numbers<[1], [0], [0], [1], [0, 0, 1, 1], [], []>} : vector<8x8xf32>, vector<8x32xf32>, vector<8x32xf32> -> vector<8x32xf32>
    %cst_5 = arith.constant dense<0.000000e+00> : vector<8xf32>
    %5 = vector.multi_reduction <add>, %1, %cst_5 [1] : vector<8x8xf32> to vector<8xf32>
    %6 = vector.shape_cast %5 : vector<8xf32> to vector<8x1xf32>
    %cst_6 = arith.constant 0.000000e+00 : f32
    %7 = vector.broadcast %cst_6 : f32 to vector<8x1xf32>
    %8 = arith.cmpf oeq, %6, %7 : vector<8x1xf32>
    %cst_7 = arith.constant 1.000000e+00 : f32
    %9 = vector.broadcast %cst_7 : f32 to vector<8x1xf32>
    %10 = arith.divf %9, %6 : vector<8x1xf32>
    %cst_8 = arith.constant 0.000000e+00 : f32
    %11 = vector.broadcast %cst_8 : f32 to vector<8x1xf32>
    %12 = arith.select %8, %11, %10 : vector<8x1xi1>, vector<8x1xf32>
    %13 = vector.broadcast %12 : vector<8x1xf32> to vector<8x32xf32>
    %14 = arith.mulf %4, %13 : vector<8x32xf32>
    %c0_9 = arith.constant 0 : index
    %c0_10 = arith.constant 0 : index
    %c0_11 = arith.constant 0 : index
    %15 = vector.load %arg4[%c0_9, %c0_10, %c0_11] : memref<1x8x32xf32, #tpu.memory_space<vmem>>, vector<1x8x32xf32>
    %16 = vector.shape_cast %15 : vector<1x8x32xf32> to vector<8x32xf32>
    %17 = vector.shape_cast %14 : vector<8x32xf32> to vector<1x8x32xf32>
    tpu.vector_store %arg4[%c0_9, %c0_10, %c0_11], %17 {strides = array<i32>} : memref<1x8x32xf32, #tpu.memory_space<vmem>>, vector<1x8x32xf32>,
    return
  }
  func.func @transform_0(%arg0: i32, %arg1: i32) -> (i32, i32, i32) {
    %c0_i32 = arith.constant 0 : i32
    %c0_i32_0 = arith.constant 0 : i32
    return %arg0, %arg1, %c0_i32 : i32, i32, i32
  }
  func.func @transform_1(%arg0: i32, %arg1: i32) -> (i32, i32, i32) {
    %c0_i32 = arith.constant 0 : i32
    %c0_i32_0 = arith.constant 0 : i32
    %c0_i32_1 = arith.constant 0 : i32
    return %arg0, %c0_i32, %c0_i32_0 : i32, i32, i32
  }
  func.func @transform_2(%arg0: i32, %arg1: i32) -> (i32, i32, i32) {
    %c0_i32 = arith.constant 0 : i32
    %c0_i32_0 = arith.constant 0 : i32
    return %arg0, %arg1, %c0_i32 : i32, i32, i32
  }
}

</mosaic_0001>

<bundles_post_ra>
// kernel: tpu_custom_call.1
= control target key start
LH: loop header
LB: loop body
LE: loop exit
PB: predicated region body
PF: predicated region fallthrough
CT: control target
= control target key end

     0   :  { %7 = vsyncpa [#allocation3], 0  ;;  %s905_s0 = inlined_call_operand.hbm [shape: f32[2,8,8], index: 0, kind: input, shape index: {}]   ;;  %s906_s1 = inlined_call_operand.hbm [shape: f32[2,8,32], index: 1, kind: input, shape index: {}]   ;;  %s907_s2 = inlined_call_operand.hbm [shape: f32[2,8,32], index: 2, kind: output, shape index: {}]  }
   0x1   :  { %9 = vsyncpa [#allocation3 + $0x1], 0 }
   0x2   :  { %10 = vsyncpa [#allocation6], 0 }
   0x3   :  { %12 = vsyncpa [#allocation6 + $0x1], 0 }
   0x4   :  { %13 = vsyncpa [#allocation4], 0 }
   0x5   :  { %15 = vsyncpa [#allocation4 + $0x1], 0  ;;  %s680_s9 = smov 0   ;;  %s682_s10 = smov 0  }
   0x6   :  { %s684_s11 = smov 0   ;;  %s686_s12 = smov 0  }
   0x7   :  { %s688_s13 = smov 0   ;;  %s690_s14 = smov 0  }
   0x8 LB: > { %s417_s15 = sadd.s32 4294967295, %s658_s14   ;;  %s418_s16 = sadd.s32 4294967294, %s658_s14   ;;  %s658_s14 = sphi %s690_s14, %s21_s14   ;;  %s654_s13 = sphi %s688_s13, %s927_s13   ;;  %s650_s12 = sphi %s686_s12, %s926_s12   ;;  %s646_s11 = sphi %s684_s11, %s925_s11   ;;  %s642_s10 = sphi %s682_s10, %s924_s10   ;;  %s638_s9 = sphi %s680_s9, %s923_s9  }
   0x9   : > { %s33_s17 = sadd.s32 1, %s654_s13  ;;  %s42_s18 = sadd.s32 1, %s646_s11 }
   0xa   : > { %p35_p0 = scmp.ge.s32.totalorder %s33_s17, 2  ;;  %p49_p1 = scmp.ne.s32.totalorder %s646_s11, %s642_s10 }
   0xb   : > { %p50_p2 = scmp.eq.s32.totalorder %s658_s14, 0  ;;  %p55_p3 = scmp.ne.s32.totalorder %s642_s10, %s638_s9 }
   0xc   : > { %s929_s17 = smov (%p35_p0, %s33_s17), 0  ;;  %p56_p5 = scmp.eq.s32.totalorder %s417_s15, 0 }
   0xd   : > { %p721_p4 = por %p50_p2, %p49_p1  ;;  %s37_s20 = ssub.s32 %s654_s13, %s929_s17 }
   0xe   : > { %p107_p6 = scmp.eq.s32.totalorder %s417_s15, 1  ;;  %p40_p7 = scmp.eq.s32.totalorder %s37_s20, 0 }
   0xf   : > { %p727_p8 = por %p56_p5, %p55_p3  ;;  %p113_p10 = scmp.eq.s32.totalorder %s418_s16, 1 }
  0x10   : > { %p731_p9 = por %p107_p6, %p49_p1  ;;  %p458_p13 = scmp.lt.s32.totalorder %s658_s14, 2 }
  0x11   : > { %s911_s21 = scalar_select %p727_p8, 1, 0 }
  0x12   : > { %s912_s22 = scalar_select %p731_p9, 1, 0 }
  0x13   : > { %s736_s23 = scalar_select %p40_p7, %s646_s11, %s42_s18  }
  0x14   : > { %p738_p11 = por %p113_p10, %p55_p3  ;;  %s745_s25 = sand.u32 1, %s646_s11  }
  0x15   : > { %s421_s26 = sshll.u32 %s745_s25, 3  ;;  %s422_s27 = sshll.u32 %s654_s13, 7 }
  0x16   : > { %s913_s24 = scalar_select %p738_p11, 1, 0 }
  0x17   : > { %s754_s30 = scalar_lea.hbm %s905_s0, %s422_s27  ;;  %s137_s3 = scalar_lea.vmem [#allocation2], %s421_s26 }
  0x18   : > { %s145_s4 = sshll.u32 %s137_s3, 4  ;;  %p762_p0 = pnand %p458_p13, %p721_p4  ;;  %s758_s4 = int_to_ptr.vmem [resolvable:$true] %s145_s4 }
  0x19   : > { %s134_s6 = scalar_lea.sflag [#allocation3], %s745_s25  ;;  %s512_s7 = scalar_lea.hbm %s754_s30, 128 }
  0x1a   : > { %p513_p3 = scmp.ne.s32.totalorder %s754_s30, %s512_s7  ;;  %p514_p5 = pneg %p762_p0 }
  0x1b   : > { %s517_s16 = scalar_lea.hbm %s905_s0, 256  ;;  %p518_p4 = scmp.lt.u32.totalorder %s754_s30, %s905_s0 }
  0x1c   : > { %p515_p6 = pnand %p514_p5, %p513_p3  ;;  %p519_p10 = scmp.lt.u32.totalorder %s517_s16, %s512_s7 }
  0x1d   : > { %p521_p12 = scmp.lt.u32.totalorder %s512_s7, %s754_s30 }
  0x1e   : > { %p516_p7 = pneg %p515_p6  ;;  %p520_p13 = por %p519_p10, %p518_p4 }
  0x20   : > { %p522_p1 = por %p521_p12, %p520_p13 }
  0x22   : > { %p523_p2 = pnand %p522_p1, %p516_p7 }
  0x24   : > { %526 = shalt.err (!%p523_p2)
}
  0x25   : > { %s527_s20 = scalar_lea.vmem %s758_s4, 128  ;;  %s660_s28 = smov [#allocation2]  }
  0x26   : > { %p528_p3 = scmp.ne.s32.totalorder %s758_s4, %s527_s20  ;;  %s532_s29 = sshll.u32 %s660_s28, 4  ;;  %s533_s29 = int_to_ptr.vmem [resolvable:$false] %s532_s29 }
  0x27   : > { %s534_s3 = scalar_lea.vmem %s533_s29, 256  ;;  %p535_p9 = scmp.lt.s32.totalorder %s758_s4, %s533_s29 }
  0x28   : > { %p530_p6 = pnand %p528_p3, %p514_p5  ;;  %p536_p4 = scmp.lt.s32.totalorder %s534_s3, %s527_s20 }
  0x2a   : > { %p531_p11 = pneg %p530_p6  ;;  %p537_p10 = por %p536_p4, %p535_p9 }
  0x2c   : > { %p538_p12 = pnand %p537_p10, %p531_p11 }
  0x2e   : > { %541 = shalt.err (!%p538_p12)
}
  0x2f   : > { %450 = dma.hbm_to_vmem [thread:$0]  (!%p762_p0), %s754_s30, 128, %s758_s4, %s134_s6  }
  0x30   : > { %p915_p1 = scmp.lt.s32.totalorder %s658_s14, 3  ;;  %p916_p2 = scmp.ge.s32.totalorder %s658_s14, 1 }
  0x31   : > { %s807_s16 = scalar_lea.hbm %s906_s1, %s422_s27  ;;  %s156_s18 = scalar_lea.vmem [#allocation5], %s421_s26 }
  0x32   : > { %p798_p7 = pnand %p916_p2, %p915_p1  ;;  %s163_s19 = sshll.u32 %s156_s18, 4  ;;  %s164_s19 = int_to_ptr.vmem [resolvable:$true] %s163_s19 }
  0x33   : > { %s153_s30 = scalar_lea.sflag [#allocation6], %s745_s25  ;;  %s542_s4 = scalar_lea.hbm %s807_s16, 128 }
  0x34   : > { %s917_s7 = scalar_select %p798_p7, 1, 0 }
  0x35   : > { %p543_p9 = scmp.ne.s32.totalorder %s807_s16, %s542_s4  ;;  %s547_s27 = scalar_lea.hbm %s906_s1, 256 }
  0x36   : > { %p548_p3 = scmp.lt.u32.totalorder %s807_s16, %s906_s1  ;;  %p549_p6 = scmp.lt.u32.totalorder %s547_s27, %s542_s4 }
  0x37   : > { %p545_p11 = pnand %p543_p9, %p514_p5  ;;  %p551_p10 = scmp.lt.u32.totalorder %s542_s4, %s807_s16 }
  0x38   : > { %p550_p4 = por %p549_p6, %p548_p3 }
  0x39   : > { %p546_p13 = pneg %p545_p11 }
  0x3a   : > { %p552_p12 = por %p551_p10, %p550_p4 }
  0x3c   : > { %p553_p1 = pnand %p552_p12, %p546_p13 }
  0x3e   : > { %556 = shalt.err (!%p553_p1)
}
  0x3f   : > { %s557_s25 = scalar_lea.vmem %s164_s19, 128  ;;  %s661_s26 = smov [#allocation5]  }
  0x40   : > { %p558_p2 = scmp.ne.s32.totalorder %s164_s19, %s557_s25  ;;  %s562_s3 = sshll.u32 %s661_s26, 4  ;;  %s563_s3 = int_to_ptr.vmem [resolvable:$false] %s562_s3 }
  0x41   : > { %s564_s8 = scalar_lea.vmem %s563_s3, 256  ;;  %p565_p8 = scmp.lt.s32.totalorder %s164_s19, %s563_s3 }
  0x42   : > { %p560_p9 = pnand %p558_p2, %p514_p5  ;;  %p566_p7 = scmp.lt.s32.totalorder %s564_s8, %s557_s25 }
  0x44   : > { %p561_p11 = pneg %p560_p9  ;;  %p567_p3 = por %p566_p7, %p565_p8 }
  0x46   : > { %p568_p6 = pnand %p567_p3, %p561_p11 }
  0x48   : > { %571 = shalt.err (!%p568_p6)
}
  0x49   : > { %453 = dma.hbm_to_vmem [thread:$0]  (!%p762_p0), %s807_s16, 128, %s164_s19, %s153_s30  }
  0x4a   : > { %p918_p13 = scmp.ne.s32.totalorder %s917_s7, 0 }
  0x4b   : > { %s834_s15 = sand.u32 (!%p918_p13), 1, %s642_s10   ;;  %p919_p8 = scmp.ne.s32.totalorder (!%p918_p13), %s911_s21, 0 }
  0x4c   : > { %172 = sbr.rel (%p918_p13) target bundleno = 317 (0x13d), region = 28  ;;  %s837_s18 = sshll.u32 (!%p918_p13), %s834_s15, 3 }
  0x4d   : > { %s175_s4 = scalar_lea.sflag (!%p918_p13), [#allocation3], %s834_s15  ;;  %s178_s6 = scalar_lea.vmem (!%p918_p13), [#allocation2], %s837_s18 }
  0x53   : > { %625 = dma.done.wait (%p919_p8), %s175_s4, 128  }
  0x54   : > { %627 = vsyncadd (%p919_p8), %s175_s4, 4294967168  ;;  %s184_s5 = scalar_lea.sflag [#allocation6], %s834_s15  ;;  %s187_s7 = scalar_lea.vmem [#allocation5], %s837_s18 }
  0x55   : > { %629 = dma.done.wait (%p919_p8), %s184_s5, 128  }
  0x56   : > { %631 = vsyncadd (%p919_p8), %s184_s5, 4294967168  ;;  %v662_v0 = vmov 0.0   ;;  %vm663_vm0 = vmmov 0   ;;  %vm215_vm1 = vcmask 64512   ;;  %v214_v1 = vld [vmem:[%s187_s7] sm:$0xff]  ;;  %v213_v2 = vld [vmem:[%s178_s6] sm:$0xff] }
  0x57   : > { %436 = vmatprep.subr.mxu0 %v662_v0  ;;  %438 = vmatprep.mubr.msk.f32.mxu0 %vm663_vm0, %v662_v0  ;;  %v289_v3 = vsel %vm215_vm1, %v213_v2, 0.0  ;;  %s431_s21 = sshll.u32 %s650_s12, 7  ;;  %s212_s16 = scalar_lea.vmem [#allocation7], %s837_s18  ;;  %vm297_vm3 = vcmask 261120  }
  0x58   : > { %437 = vmatpush3.msra.mxu0 %v214_v1  ;;  %290 = vadd.xlane.f32.xlu0 %v289_v3  ;;  %s314_s19 = sshll.u32 %s212_s16, 4  ;;  %s856_s27 = scalar_lea.hbm %s907_s2, %s431_s21  ;;  %s858_s19 = int_to_ptr.vmem [resolvable:$true] %s314_s19 }
  0x59   : > { %439 = vmatmul.mubr.msk.f32.vlgmr.msra.gmra.mrb[0].mxu0 %vm215_vm1, %v213_v2  ;;  %s300_s28 = scalar_lea.sflag [#allocation4], %s834_s15  ;;  %s572_s12 = scalar_lea.vmem %s858_s19, 128 }
  0x5a   : > { %p573_p0 = scmp.ne.s32.totalorder %s858_s19, %s572_s12  ;;  %p920_p5 = scmp.ne.s32.totalorder %s912_s22, 0 }
  0x5b   : > { %s664_s29 = smov [#allocation7]  }
  0x5c   : > { %p574_p7 = pnand %p573_p0, %p920_p5  ;;  %s576_s25 = sshll.u32 %s664_s29, 4  ;;  %s577_s25 = int_to_ptr.vmem [resolvable:$false] %s576_s25 }
  0x5d   : > { %s578_s26 = scalar_lea.vmem %s577_s25, 256  ;;  %p579_p10 = scmp.lt.s32.totalorder %s858_s19, %s577_s25 }
  0x5e   : > { %p575_p4 = pneg %p574_p7  ;;  %p580_p12 = scmp.lt.s32.totalorder %s578_s26, %s572_s12 }
  0x60   : > { %p581_p1 = por %p580_p12, %p579_p10 }
  0x62   : > { %p582_p2 = pnand %p581_p1, %p575_p4 }
  0xe5   : > { %v291_v4 = vpop.xlane.xlu0 %290 }
  0xe6   : > { %510 = vrcp.f32 %v291_v4  ;;  %vm292_vm2 = vcmp.eq.f32.partialorder %v291_v4, 0.0 }
  0xf0   : > { %v511_v5 = vpop.eup %510 }
  0xf1   : > { %v295_v7 = vsel %vm292_vm2, 0.0, %v511_v5 }
 0x12c   : > { %v285_v6 = vpop.f32.mrb[0].mxu0 }
 0x12d   : > { %v296_v8 = vmul.f32 %v295_v7, %v285_v6  ;;  %v440_v9 = vpop.f32.mrb[1].mxu0 }
 0x12f   : > { %298 = vst.msk [vmem:[%s212_s16] sm:$0xff] %vm297_vm3, %v296_v8 }
 0x130   : > { %585 = shalt.err (!%p582_p2)
}
 0x131   : > { %s586_s3 = scalar_lea.hbm %s856_s27, 128  ;;  %s590_s18 = scalar_lea.hbm %s907_s2, 256 }
 0x132   : > { %p587_p9 = scmp.ne.s32.totalorder %s856_s27, %s586_s3  ;;  %p591_p6 = scmp.lt.u32.totalorder %s856_s27, %s907_s2 }
 0x133   : > { %p592_p13 = scmp.lt.u32.totalorder %s590_s18, %s586_s3  ;;  %p594_p0 = scmp.lt.u32.totalorder %s586_s3, %s856_s27 }
 0x134   : > { %p588_p11 = pnand %p587_p9, %p920_p5 }
 0x135   : > { %p593_p8 = por %p592_p13, %p591_p6 }
 0x136   : > { %p589_p3 = pneg %p588_p11 }
 0x137   : > { %p595_p7 = por %p594_p0, %p593_p8 }
 0x139   : > { %p596_p4 = pnand %p595_p7, %p589_p3 }
 0x13b   : > { %599 = shalt.err (!%p596_p4)
}
 0x13c   : > { %445 = dma.vmem_to_hbm [thread:$0]  (%p920_p5), %s858_s19, 128, %s856_s27, %s300_s28  }
 0x13d PF: > { %s326_s5 = sand.u32 1, %s638_s9   ;;  %p921_p10 = scmp.ne.s32.totalorder %s913_s24, 0 }
 0x13e   : > { %p922_p12 = scmp.ge.s32.totalorder %s658_s14, 2  ;;  %s327_s7 = scalar_lea.sflag [#allocation4], %s326_s5 }
 0x140   : > { %p455_p1 = pnand %p922_p12, %p921_p10 }
 0x142   : > { %633 = dma.done.wait (!%p455_p1), %s327_s7, 128  }
 0x143   : > { %635 = vsyncadd (!%p455_p1), %s327_s7, 4294967168  ;;  %s21_s14 = sadd.s32 1, %s658_s14   ;;  %s923_s9 = smov %s642_s10 }
 0x144   : > { %p18_p2 = scmp.ge.s32.totalorder %s21_s14, 4   ;;  %s924_s10 = smov %s646_s11 }
 0x145   : > { %s925_s11 = smov %s736_s23  ;;  %s926_s12 = smov %s654_s13 }
 0x146   : > { %s927_s13 = smov %s929_s17  ;;  %20 = sbr.rel (!%p18_p2) target bundleno = 8 (0x8), region = 86 }
 0x14d   :  { %332 = vsyncpa [#allocation3], 1 }
 0x14e   :  { %334 = vsyncpa [#allocation3 + $0x1], 1 }
 0x14f   :  { %335 = vsyncpa [#allocation6], 1 }
 0x150   :  { %337 = vsyncpa [#allocation6 + $0x1], 1 }
 0x151   :  { %338 = vsyncpa [#allocation4], 1 }
 0x152   :  { %340 = vsyncpa [#allocation4 + $0x1], 1 }

</bundles_post_ra>
